<compile_context>
chip_gen: v5e
topology: v5e:2x2
jax: 0.10.0
libtpu: 0.0.40
codegen_flags: <defaults>
</compile_context>

<pallas_src>
import jax
import jax.numpy as jnp
from jax.experimental import pallas as pl
from jax.experimental.pallas import tpu as pltpu

LANE = 128
SUBLANE = 8


def _round_up(n: int, m: int) -> int:
    return ((n + m - 1) // m) * m


def _cdiv(a: int, b: int) -> int:
    return -(-a // b)


def generator_kernel(x_ref, w1_ref, b1_ref, w2_ref, b2_ref, o_ref):
    """One batch tile of fc2(relu(fc1(x))).

    x_ref : (TM, D_in_p)    input dtype (cast to MXU dtype in-kernel)
    w1_ref: (D_in_p, H_p)   compute dtype (bf16 or f32)
    b1_ref: (1, H_p)        f32
    w2_ref: (H_p, D_out_p)  compute dtype
    b2_ref: (1, D_out_p)    f32
    o_ref : (TM, D_out_p)   output dtype (lane-dense, multiple of 128)
    """
    # In-kernel cast (free VPU filler under the MXU matmuls; avoids a wrapper
    # cast pass over x in HBM).
    x = x_ref[...].astype(w1_ref.dtype)
    # fc1 on the MXU, f32 accumulation.
    h = jnp.dot(x, w1_ref[...], preferred_element_type=jnp.float32)
    # Bias add + ReLU in f32 (v5e has no bf16 VPU).
    h = jnp.maximum(h + b1_ref[...], 0.0)
    # fc2 on the MXU.
    out = jnp.dot(h.astype(w2_ref.dtype), w2_ref[...],
                  preferred_element_type=jnp.float32)
    o_ref[...] = (out + b2_ref[...]).astype(o_ref.dtype)


def _vmem_cap_bytes() -> int:
    """Per-core VMEM budget cap: generous on 128 MiB parts, safe on v7x (64 MiB)."""
    try:
        cap = int(pltpu.get_tpu_info().vmem_capacity_bytes)
        return min(100 * 1024 * 1024, cap * 7 // 8)
    except Exception:
        return 56 * 1024 * 1024  # safe under v7x's 64 MiB physical VMEM


def _per_step_vmem(tm, d_in_p, h_p, d_out_p, x_bytes, c_bytes, o_bytes, w_bufs):
    return (2 * tm * d_in_p * x_bytes                              # x tiles (double-buffered)
            + 2 * tm * d_out_p * o_bytes                           # out tiles (double-buffered)
            + w_bufs * (d_in_p * h_p + h_p * d_out_p) * c_bytes    # resident weights
            + w_bufs * (h_p + d_out_p) * 4                         # resident biases (f32)
            + tm * h_p * 4                                         # f32 hidden intermediate
            + tm * max(d_in_p, d_out_p) * 4)                       # cast / accumulator headroom


def generator_forward(x, w1, b1, w2, b2, *, block_batch=512,
                      compute_dtype=jnp.bfloat16, out_dtype=None):
    """fc2(relu(fc1(x))).

    x: (B, D_in); w1: (D_in, H); b1: (H,) or (1, H); w2: (H, D_out);
    b2: (D_out,) or (1, D_out).

    compute_dtype: MXU input dtype (bf16 default; pass jnp.float32 as the
      documented accuracy escape hatch -- accumulation is always f32).
    out_dtype: output dtype (defaults to x.dtype to preserve the PyTorch
      module's semantics; pass bf16 to halve output HBM writes downstream).
    """
    B, D_in = x.shape
    H = w1.shape[1]
    D_out = w2.shape[1]
    out_dtype = jnp.dtype(x.dtype if out_dtype is None else out_dtype)
    compute_dtype = jnp.dtype(compute_dtype)

    d_in_p = _round_up(D_in, LANE)
    h_p = _round_up(H, LANE)
    d_out_p = _round_up(D_out, LANE)

    x_bytes = jnp.dtype(x.dtype).itemsize
    c_bytes = compute_dtype.itemsize
    o_bytes = out_dtype.itemsize

    # Grid-invariant weight/bias blocks only need one VMEM buffer.
    single_buffer_weights = hasattr(pl, "Buffered")
    w_bufs = 1 if single_buffer_weights else 2

    # --- Batch tiling: balance tiles against B so padding waste stays small,
    # and give megacore (v7x: 2 TCs) at least two tiles when the batch allows.
    n_tiles = max(1, _cdiv(B, max(int(block_batch), SUBLANE)))
    if n_tiles == 1 and B > SUBLANE:
        n_tiles = 2
    tm = _round_up(_cdiv(B, n_tiles), SUBLANE)
    tm = min(tm, _round_up(B, SUBLANE))

    # Shrink tm if the per-step VMEM residency would exceed the budget cap.
    vmem_cap = _vmem_cap_bytes()
    while tm > SUBLANE and _per_step_vmem(tm, d_in_p, h_p, d_out_p, x_bytes,
                                          c_bytes, o_bytes, w_bufs) > vmem_cap:
        tm = _round_up(tm // 2, SUBLANE)
    b_p = _round_up(B, tm)
    grid = (b_p // tm,)
    # TODO(synk): if the resident (padded) weights alone exceed vmem_cap, add a
    # K-reduction grid axis over H/D_in with a pl.when-initialized f32
    # accumulator instead of whole-weight residency (hit first on v7x).

    # --- Operand prep. Fast path: zero extra HBM passes when already aligned.
    if (b_p, d_in_p) == (B, D_in):
        x_in = x
    else:
        x_in = jnp.zeros((b_p, d_in_p), x.dtype).at[:B, :D_in].set(x)

    # TODO(synk): in a real model, cast/pad the parameters once at init time
    # instead of on every forward call.
    def _prep(a, shape_p, dt):
        a = jnp.asarray(a)
        if a.dtype != dt:
            a = a.astype(dt)
        if a.shape != shape_p:
            a = jnp.zeros(shape_p, dt).at[:a.shape[0], :a.shape[1]].set(a)
        return a

    w1_p = _prep(w1, (d_in_p, h_p), compute_dtype)
    w2_p = _prep(w2, (h_p, d_out_p), compute_dtype)
    b1_p = _prep(jnp.asarray(b1).reshape(1, -1), (1, h_p), jnp.float32)
    b2_p = _prep(jnp.asarray(b2).reshape(1, -1), (1, d_out_p), jnp.float32)

    # Advisory hint so XLA schedules/overlaps the custom call sensibly.
    cost = pl.CostEstimate(
        flops=2 * B * (D_in * H + H * D_out),
        transcendentals=0,
        bytes_accessed=int(b_p * d_in_p * x_bytes
                           + (d_in_p * h_p + h_p * d_out_p) * c_bytes
                           + (h_p + d_out_p) * 4
                           + b_p * d_out_p * o_bytes))

    def _run(use_single_buffer):
        resident_kw = {}
        if use_single_buffer:
            resident_kw = dict(pipeline_mode=pl.Buffered(1))
        in_specs = [
            pl.BlockSpec((tm, d_in_p), lambda i: (i, 0)),                    # x tile
            pl.BlockSpec((d_in_p, h_p), lambda i: (0, 0), **resident_kw),    # w1
            pl.BlockSpec((1, h_p), lambda i: (0, 0), **resident_kw),         # b1
            pl.BlockSpec((h_p, d_out_p), lambda i: (0, 0), **resident_kw),   # w2
            pl.BlockSpec((1, d_out_p), lambda i: (0, 0), **resident_kw),     # b2
        ]
        bufs = 1 if use_single_buffer else 2
        per_step = _per_step_vmem(tm, d_in_p, h_p, d_out_p,
                                  x_bytes, c_bytes, o_bytes, bufs)
        vmem_limit = int(min(vmem_cap,
                             max(per_step * 115 // 100, 16 * 1024 * 1024)))
        return pl.pallas_call(
            generator_kernel,
            out_shape=jax.ShapeDtypeStruct((b_p, d_out_p), out_dtype),
            grid_spec=pltpu.PrefetchScalarGridSpec(
                num_scalar_prefetch=0,
                grid=grid,
                in_specs=in_specs,
                out_specs=pl.BlockSpec((tm, d_out_p), lambda i: (i, 0)),
            ),
            compiler_params=pltpu.CompilerParams(
                dimension_semantics=("parallel",),   # independent batch tiles
                vmem_limit_bytes=vmem_limit,
            ),
            cost_estimate=cost,
        )(x_in, w1_p, b1_p, w2_p, b2_p)

    if single_buffer_weights:
        try:
            out_p = _run(True)
        except Exception:
            # pipeline_mode=pl.Buffered(1) not supported by this JAX build.
            out_p = _run(False)
    else:
        out_p = _run(False)

    if (b_p, d_out_p) == (B, D_out):
        return out_p
    return out_p[:B, :D_out]


def _init_linear(key, in_dim, out_dim):
    """Deterministic init mimicking nn.Linear's uniform(-1/sqrt(in), 1/sqrt(in)).
    Weight returned already transposed to (in_dim, out_dim)."""
    kw, kb = jax.random.split(key)
    bound = 1.0 / (in_dim ** 0.5)
    w = jax.random.uniform(kw, (in_dim, out_dim), jnp.float32, -bound, bound)
    b = jax.random.uniform(kb, (1, out_dim), jnp.float32, -bound, bound)
    return w, b


def _reference(x, w1, b1, w2, b2):
    return jnp.maximum(x @ w1 + b1, 0.0) @ w2 + b2


if __name__ == "__main__":
    key = jax.random.PRNGKey(0)
    k1, k2, k3, k4 = jax.random.split(key, 4)

    # Case 1: small, unaligned shapes -> exercises feature/batch padding, a
    # 3-tile batch grid, and bf16 MXU inputs with f32 accumulation.
    batch, d_in, d_hid, d_out = 20, 16, 32, 8
    x = jax.random.normal(k1, (batch, d_in), jnp.float32)
    w1, b1 = _init_linear(k2, d_in, d_hid)
    w2, b2 = _init_linear(k3, d_hid, d_out)
    out = jax.block_until_ready(
        generator_forward(x, w1, b1, w2, b2, block_batch=8))
    ref = _reference(x, w1, b1, w2, b2)
    assert out.shape == (batch, d_out)
    assert jnp.allclose(out, ref, atol=5e-2, rtol=5e-2), float(
        jnp.max(jnp.abs(out - ref)))

    # Case 2: 128-aligned shapes -> exercises the no-pad / no-cast / no-slice
    # fast path, a 2-tile grid, and the f32 accuracy escape hatch.
    batch, d_in, d_hid, d_out = 256, 128, 256, 128
    x = jax.random.normal(k4, (batch, d_in), jnp.float32)
    w1, b1 = _init_linear(k2, d_in, d_hid)
    w2, b2 = _init_linear(k3, d_hid, d_out)
    out = jax.block_until_ready(
        generator_forward(x, w1, b1, w2, b2, block_batch=128,
                          compute_dtype=jnp.float32))
    ref = _reference(x, w1, b1, w2, b2)
    assert out.shape == (batch, d_out)
    assert jnp.allclose(out, ref, atol=5e-2, rtol=5e-2), float(
        jnp.max(jnp.abs(out - ref)))

    print("KERNEL_OK")
</pallas_src>

<mosaic_0001>
module attributes {stable_mosaic.version = 11 : i64} {
  func.func @generator_kernel(%arg0: i32, %arg1: memref<8x128xf32, #tpu.memory_space<vmem>>, %arg2: memref<128x128xbf16, #tpu.memory_space<vmem>>, %arg3: memref<1x128xf32, #tpu.memory_space<vmem>>, %arg4: memref<128x128xbf16, #tpu.memory_space<vmem>>, %arg5: memref<1x128xf32, #tpu.memory_space<vmem>>, %arg6: memref<8x128xf32, #tpu.memory_space<vmem>>) attributes {dimension_semantics = [#tpu.dimension_semantics<parallel>], iteration_bounds = array<i64: 3>, scalar_prefetch = 0 : i64, scratch_operands = 0 : i64, tpu.core_type = #tpu.core_type<tc>, window_params = [{transform_indices = @transform_0, window_bounds = array<i64: 8, 128>}, {pipeline_mode = #tpu.pipeline_mode<synchronous>, transform_indices = @transform_1, window_bounds = array<i64: 128, 128>}, {pipeline_mode = #tpu.pipeline_mode<synchronous>, transform_indices = @transform_2, window_bounds = array<i64: 1, 128>}, {pipeline_mode = #tpu.pipeline_mode<synchronous>, transform_indices = @transform_3, window_bounds = array<i64: 128, 128>}, {pipeline_mode = #tpu.pipeline_mode<synchronous>, transform_indices = @transform_4, window_bounds = array<i64: 1, 128>}, {transform_indices = @transform_5, window_bounds = array<i64: 8, 128>}]} {
    %c0 = arith.constant 0 : index
    %c0_0 = arith.constant 0 : index
    %0 = vector.load %arg1[%c0, %c0_0] : memref<8x128xf32, #tpu.memory_space<vmem>>, vector<8x128xf32>
    %1 = arith.truncf %0 : vector<8x128xf32> to vector<8x128xbf16>
    %c0_1 = arith.constant 0 : index
    %c0_2 = arith.constant 0 : index
    %2 = vector.load %arg2[%c0_1, %c0_2] : memref<128x128xbf16, #tpu.memory_space<vmem>>, vector<128x128xbf16>
    %cst = arith.constant dense<0.000000e+00> : vector<8x128xf32>
    %3 = tpu.matmul %1, %2, %cst {dimension_numbers = #tpu.dot_dimension_numbers<[1], [0], [0], [1], [0, 0, 1, 1], [], []>} : vector<8x128xbf16>, vector<128x128xbf16>, vector<8x128xf32> -> vector<8x128xf32>
    %c0_3 = arith.constant 0 : index
    %c0_4 = arith.constant 0 : index
    %4 = vector.load %arg3[%c0_3, %c0_4] : memref<1x128xf32, #tpu.memory_space<vmem>>, vector<1x128xf32>
    %5 = vector.broadcast %4 : vector<1x128xf32> to vector<8x128xf32>
    %6 = arith.addf %3, %5 : vector<8x128xf32>
    %cst_5 = arith.constant 0.000000e+00 : f32
    %7 = vector.broadcast %cst_5 : f32 to vector<8x128xf32>
    %8 = arith.maximumf %6, %7 : vector<8x128xf32>
    %9 = arith.truncf %8 : vector<8x128xf32> to vector<8x128xbf16>
    %c0_6 = arith.constant 0 : index
    %c0_7 = arith.constant 0 : index
    %10 = vector.load %arg4[%c0_6, %c0_7] : memref<128x128xbf16, #tpu.memory_space<vmem>>, vector<128x128xbf16>
    %cst_8 = arith.constant dense<0.000000e+00> : vector<8x128xf32>
    %11 = tpu.matmul %9, %10, %cst_8 {dimension_numbers = #tpu.dot_dimension_numbers<[1], [0], [0], [1], [0, 0, 1, 1], [], []>} : vector<8x128xbf16>, vector<128x128xbf16>, vector<8x128xf32> -> vector<8x128xf32>
    %c0_9 = arith.constant 0 : index
    %c0_10 = arith.constant 0 : index
    %12 = vector.load %arg5[%c0_9, %c0_10] : memref<1x128xf32, #tpu.memory_space<vmem>>, vector<1x128xf32>
    %13 = vector.broadcast %12 : vector<1x128xf32> to vector<8x128xf32>
    %14 = arith.addf %11, %13 : vector<8x128xf32>
    %c0_11 = arith.constant 0 : index
    %c0_12 = arith.constant 0 : index
    %15 = vector.load %arg6[%c0_11, %c0_12] : memref<8x128xf32, #tpu.memory_space<vmem>>, vector<8x128xf32>
    tpu.vector_store %arg6[%c0_11, %c0_12], %14 {strides = array<i32>} : memref<8x128xf32, #tpu.memory_space<vmem>>, vector<8x128xf32>,
    return
  }
  func.func @transform_0(%arg0: i32) -> (i32, i32) {
    %c0_i32 = arith.constant 0 : i32
    %c0_i32_0 = arith.constant 0 : i32
    return %arg0, %c0_i32 : i32, i32
  }
  func.func @transform_1(%arg0: i32) -> (i32, i32) {
    %c0_i32 = arith.constant 0 : i32
    %c0_i32_0 = arith.constant 0 : i32
    %c0_i32_1 = arith.constant 0 : i32
    return %c0_i32, %c0_i32_0 : i32, i32
  }
  func.func @transform_2(%arg0: i32) -> (i32, i32) {
    %c0_i32 = arith.constant 0 : i32
    %c0_i32_0 = arith.constant 0 : i32
    %c0_i32_1 = arith.constant 0 : i32
    return %c0_i32, %c0_i32_0 : i32, i32
  }
  func.func @transform_3(%arg0: i32) -> (i32, i32) {
    %c0_i32 = arith.constant 0 : i32
    %c0_i32_0 = arith.constant 0 : i32
    %c0_i32_1 = arith.constant 0 : i32
    return %c0_i32, %c0_i32_0 : i32, i32
  }
  func.func @transform_4(%arg0: i32) -> (i32, i32) {
    %c0_i32 = arith.constant 0 : i32
    %c0_i32_0 = arith.constant 0 : i32
    %c0_i32_1 = arith.constant 0 : i32
    return %c0_i32, %c0_i32_0 : i32, i32
  }
  func.func @transform_5(%arg0: i32) -> (i32, i32) {
    %c0_i32 = arith.constant 0 : i32
    %c0_i32_0 = arith.constant 0 : i32
    return %arg0, %c0_i32 : i32, i32
  }
}

module attributes {stable_mosaic.version = 11 : i64} {
  func.func @generator_kernel(%arg0: i32, %arg1: memref<8x128xf32, #tpu.memory_space<vmem>>, %arg2: memref<128x128xbf16, #tpu.memory_space<vmem>>, %arg3: memref<1x128xf32, #tpu.memory_space<vmem>>, %arg4: memref<128x128xbf16, #tpu.memory_space<vmem>>, %arg5: memref<1x128xf32, #tpu.memory_space<vmem>>, %arg6: memref<8x128xf32, #tpu.memory_space<vmem>>) attributes {dimension_semantics = [#tpu.dimension_semantics<parallel>], iteration_bounds = array<i64: 3>, scalar_prefetch = 0 : i64, scratch_operands = 0 : i64, tpu.core_type = #tpu.core_type<tc>, window_params = [{transform_indices = @transform_0, window_bounds = array<i64: 8, 128>}, {pipeline_mode = #tpu.pipeline_mode<synchronous>, transform_indices = @transform_1, window_bounds = array<i64: 128, 128>}, {pipeline_mode = #tpu.pipeline_mode<synchronous>, transform_indices = @transform_2, window_bounds = array<i64: 1, 128>}, {pipeline_mode = #tpu.pipeline_mode<synchronous>, transform_indices = @transform_3, window_bounds = array<i64: 128, 128>}, {pipeline_mode = #tpu.pipeline_mode<synchronous>, transform_indices = @transform_4, window_bounds = array<i64: 1, 128>}, {transform_indices = @transform_5, window_bounds = array<i64: 8, 128>}]} {
    %c0 = arith.constant 0 : index
    %c0_0 = arith.constant 0 : index
    %0 = vector.load %arg1[%c0, %c0_0] : memref<8x128xf32, #tpu.memory_space<vmem>>, vector<8x128xf32>
    %1 = arith.truncf %0 : vector<8x128xf32> to vector<8x128xbf16>
    %c0_1 = arith.constant 0 : index
    %c0_2 = arith.constant 0 : index
    %2 = vector.load %arg2[%c0_1, %c0_2] : memref<128x128xbf16, #tpu.memory_space<vmem>>, vector<128x128xbf16>
    %cst = arith.constant dense<0.000000e+00> : vector<8x128xf32>
    %3 = tpu.matmul %1, %2, %cst {dimension_numbers = #tpu.dot_dimension_numbers<[1], [0], [0], [1], [0, 0, 1, 1], [], []>} : vector<8x128xbf16>, vector<128x128xbf16>, vector<8x128xf32> -> vector<8x128xf32>
    %c0_3 = arith.constant 0 : index
    %c0_4 = arith.constant 0 : index
    %4 = vector.load %arg3[%c0_3, %c0_4] : memref<1x128xf32, #tpu.memory_space<vmem>>, vector<1x128xf32>
    %5 = vector.broadcast %4 : vector<1x128xf32> to vector<8x128xf32>
    %6 = arith.addf %3, %5 : vector<8x128xf32>
    %cst_5 = arith.constant 0.000000e+00 : f32
    %7 = vector.broadcast %cst_5 : f32 to vector<8x128xf32>
    %8 = arith.maximumf %6, %7 : vector<8x128xf32>
    %9 = arith.truncf %8 : vector<8x128xf32> to vector<8x128xbf16>
    %c0_6 = arith.constant 0 : index
    %c0_7 = arith.constant 0 : index
    %10 = vector.load %arg4[%c0_6, %c0_7] : memref<128x128xbf16, #tpu.memory_space<vmem>>, vector<128x128xbf16>
    %cst_8 = arith.constant dense<0.000000e+00> : vector<8x128xf32>
    %11 = tpu.matmul %9, %10, %cst_8 {dimension_numbers = #tpu.dot_dimension_numbers<[1], [0], [0], [1], [0, 0, 1, 1], [], []>} : vector<8x128xbf16>, vector<128x128xbf16>, vector<8x128xf32> -> vector<8x128xf32>
    %c0_9 = arith.constant 0 : index
    %c0_10 = arith.constant 0 : index
    %12 = vector.load %arg5[%c0_9, %c0_10] : memref<1x128xf32, #tpu.memory_space<vmem>>, vector<1x128xf32>
    %13 = vector.broadcast %12 : vector<1x128xf32> to vector<8x128xf32>
    %14 = arith.addf %11, %13 : vector<8x128xf32>
    %c0_11 = arith.constant 0 : index
    %c0_12 = arith.constant 0 : index
    %15 = vector.load %arg6[%c0_11, %c0_12] : memref<8x128xf32, #tpu.memory_space<vmem>>, vector<8x128xf32>
    tpu.vector_store %arg6[%c0_11, %c0_12], %14 {strides = array<i32>} : memref<8x128xf32, #tpu.memory_space<vmem>>, vector<8x128xf32>,
    return
  }
  func.func @transform_0(%arg0: i32) -> (i32, i32) {
    %c0_i32 = arith.constant 0 : i32
    %c0_i32_0 = arith.constant 0 : i32
    return %arg0, %c0_i32 : i32, i32
  }
  func.func @transform_1(%arg0: i32) -> (i32, i32) {
    %c0_i32 = arith.constant 0 : i32
    %c0_i32_0 = arith.constant 0 : i32
    %c0_i32_1 = arith.constant 0 : i32
    return %c0_i32, %c0_i32_0 : i32, i32
  }
  func.func @transform_2(%arg0: i32) -> (i32, i32) {
    %c0_i32 = arith.constant 0 : i32
    %c0_i32_0 = arith.constant 0 : i32
    %c0_i32_1 = arith.constant 0 : i32
    return %c0_i32, %c0_i32_0 : i32, i32
  }
  func.func @transform_3(%arg0: i32) -> (i32, i32) {
    %c0_i32 = arith.constant 0 : i32
    %c0_i32_0 = arith.constant 0 : i32
    %c0_i32_1 = arith.constant 0 : i32
    return %c0_i32, %c0_i32_0 : i32, i32
  }
  func.func @transform_4(%arg0: i32) -> (i32, i32) {
    %c0_i32 = arith.constant 0 : i32
    %c0_i32_0 = arith.constant 0 : i32
    %c0_i32_1 = arith.constant 0 : i32
    return %c0_i32, %c0_i32_0 : i32, i32
  }
  func.func @transform_5(%arg0: i32) -> (i32, i32) {
    %c0_i32 = arith.constant 0 : i32
    %c0_i32_0 = arith.constant 0 : i32
    return %arg0, %c0_i32 : i32, i32
  }
}

</mosaic_0001>

<bundles_post_ra>
// kernel: tpu_custom_call.1
= control target key start
LH: loop header
LB: loop body
LE: loop exit
PB: predicated region body
PF: predicated region fallthrough
CT: control target
= control target key end

     0   :  { %10 = vsyncpa [#allocation3], 0  ;;  %s1066_s0 = inlined_call_operand.hbm [shape: f32[24,128], index: 0, kind: input, shape index: {}]   ;;  %s1067_s1 = inlined_call_operand.hbm [shape: bf16[128,128], index: 1, kind: input, shape index: {}]   ;;  %s1068_s2 = inlined_call_operand.vmem [shape: f32[1,128], index: 2, kind: input, shape index: {}]   ;;  %s1069_s3 = inlined_call_operand.hbm [shape: bf16[128,128], index: 3, kind: input, shape index: {}]   ;;  %s1070_s4 = inlined_call_operand.vmem [shape: f32[1,128], index: 4, kind: input, shape index: {}]   ;;  %s1071_s5 = inlined_call_operand.hbm [shape: f32[24,128], index: 5, kind: output, shape index: {}]  }
   0x1   :  { %12 = vsyncpa [#allocation3 + $0x1], 0 }
   0x2   :  { %13 = vsyncpa [#allocation6], 0 }
   0x3   :  { %14 = vsyncpa [#allocation4], 0 }
   0x4   :  { %16 = vsyncpa [#allocation4 + $0x1], 0  ;;  %s910_s18 = smov 0   ;;  %s912_s19 = smov 0  }
   0x5   :  { %s914_s20 = smov 0   ;;  %s916_s21 = smov 0  }
   0x6 LB: > { %s174_s24 = sshll.u32 %s1067_s1, 4  ;;  %s934_s25 = sadd.s32 4294967295, %s874_s21   ;;  %s874_s21 = sphi %s916_s21, %s1081_s21   ;;  %s870_s20 = sphi %s914_s20, %s1080_s20   ;;  %s866_s19 = sphi %s912_s19, %s1079_s19   ;;  %s862_s18 = sphi %s910_s18, %s1078_s18   ;;  %s175_s24 = int_to_ptr.hbm [resolvable:$true] %s174_s24 }
   0x7   : > { %p548_p0 = scmp.ge.s32.totalorder %s874_s21, 1  ;;  %p43_p1 = scmp.eq.s32.totalorder %s934_s25, 0 }
   0x8   : > { %p163_p2 = scmp.lt.s32.totalorder %s874_s21, 4  ;;  %s876_s27 = smov [#allocation5]  }
   0x9   : > { %s176_s28 = sshll.u32 %s876_s27, 4  ;;  %s191_s6 = sshll.u32 %s1069_s3, 4  ;;  %s177_s28 = int_to_ptr.vmem [resolvable:$true] %s176_s28  ;;  %s192_s6 = int_to_ptr.hbm [resolvable:$true] %s191_s6 }
   0xa   : > { %p939_p3 = pnand %p548_p0, %p163_p2  ;;  %s877_s7 = smov [#allocation7]  }
   0xb   : > { %s193_s8 = sshll.u32 %s877_s7, 4  ;;  %s878_s9 = smov 64   ;;  %s194_s8 = int_to_ptr.vmem [resolvable:$true] %s193_s8 }
   0xc   : > { %p655_p4 = pneg %p939_p3  ;;  %s879_s10 = smov 4  }
   0xd   : > { %s547_s11 = sadd.s32 4294967294, %s874_s21   ;;  %s952_s12 = sadd.s32 1, %s874_s21  }
   0xe   : > { %p656_p5 = pnand %p655_p4, %p43_p1  ;;  %s26_s13 = ssub.s32 %s874_s21, %s952_s12 }
   0xf   : > { %s29_s14 = sadd.s32 1, %s870_s20  ;;  %p27_p6 = scmp.eq.s32.totalorder %s26_s13, 0 }
  0x10   : > { %658 = dma.hbm_to_vmem [thread:$0]  (!%p656_p5), %s175_s24, 1024, %s177_s28, [#allocation6], %s878_s9, %s878_s9, %s879_s10  }
  0x11   : > { %661 = dma.hbm_to_vmem [thread:$0]  (!%p656_p5), %s192_s6, 1024, %s194_s8, [#allocation6], %s878_s9, %s878_s9, %s879_s10  }
  0x12   : > { %p36_p7 = scmp.ne.s32.totalorder %s870_s20, %s866_s19  ;;  %p37_p8 = scmp.eq.s32.totalorder %s874_s21, 0 }
  0x13   : > { %p42_p9 = scmp.ne.s32.totalorder %s866_s19, %s862_s18  ;;  %p150_p12 = scmp.eq.s32.totalorder %s934_s25, 2 }
  0x14   : > { %s963_s15 = scalar_select %p27_p6, %s870_s20, %s29_s14  }
  0x15   : > { %p965_p10 = por %p37_p8, %p36_p7  ;;  %p971_p11 = por %p43_p1, %p42_p9 }
  0x16   : > { %p156_p13 = scmp.eq.s32.totalorder %s547_s11, 2  ;;  %p672_p0 = scmp.lt.s32.totalorder %s874_s21, 3 }
  0x17   : > { %s210_s22 = sand.u32 1, %s870_s20   ;;  %p978_p2 = por %p150_p12, %p36_p7 }
  0x18   : > { %p982_p4 = por %p156_p13, %p42_p9  ;;  %s552_s27 = sshll.u32 %s210_s22, 3 }
  0x19   : > { %s553_s28 = sshll.u32 %s874_s21, 3  ;;  %s214_s7 = scalar_lea.vmem [#allocation2], %s552_s27 }
  0x1a   : > { %s218_s6 = scalar_lea.hbm %s1066_s0, %s553_s28  ;;  %s222_s8 = sshll.u32 %s214_s7, 4  ;;  %s223_s8 = int_to_ptr.vmem [resolvable:$true] %s222_s8 }
  0x1b   : > { %s220_s9 = sshll.u32 %s218_s6, 4  ;;  %p992_p5 = pnand %p672_p0, %p965_p10  ;;  %s221_s9 = int_to_ptr.hbm [resolvable:$true] %s220_s9 }
  0x1c   : > { %s211_s11 = scalar_lea.sflag [#allocation3], %s210_s22  ;;  %s774_s13 = sshra.s32 %s221_s9, 4  ;;  %s775_s13 = int_to_ptr.hbm [resolvable:$true] %s774_s13 }
  0x1d   : > { %s776_s14 = scalar_lea.hbm %s775_s13, 8  ;;  %p778_p7 = pneg %p992_p5 }
  0x1e   : > { %p777_p6 = scmp.ne.s32.totalorder %s775_s13, %s776_s14  ;;  %s781_s29 = scalar_lea.hbm %s1066_s0, 24 }
  0x1f   : > { %p782_p10 = scmp.lt.s32.totalorder %s775_s13, %s1066_s0  ;;  %p783_p12 = scmp.lt.s32.totalorder %s781_s29, %s776_s14 }
  0x20   : > { %p779_p8 = pnand %p778_p7, %p777_p6 }
  0x21   : > { %p784_p13 = por %p783_p12, %p782_p10 }
  0x22   : > { %p780_p9 = pneg %p779_p8 }
  0x24   : > { %p785_p0 = pnand %p784_p13, %p780_p9 }
  0x26   : > { %788 = shalt.err (!%p785_p0)
}
  0x27   : > { %665 = dma.hbm_to_vmem [thread:$0]  (!%p992_p5), %s221_s9, 128, %s223_s8, %s211_s11  }
  0x28   : > { %231 = sbr.rel (%p939_p3) target bundleno = 346 (0x15a), region = 40  ;;  %s1009_s22 = sand.u32 (!%p939_p3), 1, %s866_s19  }
  0x29   : > { %s555_s6 = sshll.u32 (!%p939_p3), %s1009_s22, 3  ;;  %s234_s7 = scalar_lea.sflag (!%p939_p3), [#allocation3], %s1009_s22 }
  0x2a   : > { %s1015_s13 = scalar_lea.vmem (!%p939_p3), [#allocation2], %s555_s6 }
  0x2d   : > { %849 = dma.done.wait (%p971_p11), %s234_s7, 128  }
  0x2e   : > { %851 = vsyncadd (%p971_p11), %s234_s7, 4294967168 }
  0x2f   : > { %853 = dma.done.wait (%p43_p1), [#allocation6], 2048  }
  0x30   : > { %855 = vsyncadd (%p43_p1), [#allocation6], 4294965248  ;;  %v634_v0 = vld [vmem:[#allocation5 + $0x38] sm:$0xff]  ;;  %v633_v1 = vld [vmem:[#allocation5 + $0x30] sm:$0xff]  ;;  %s624_s8 = sshll.u32 %s934_s25, 3  ;;  %s274_s28 = scalar_lea.vmem [#allocation8], %s555_s6 }
  0x31   : > { %345 = vmatpush.bf16.msra.mxu0 %v634_v0  ;;  %v642_v2 = vld [vmem:[#allocation7 + $0x38] sm:$0xff]  ;;  %v641_v3 = vld [vmem:[#allocation7 + $0x30] sm:$0xff]  ;;  %v632_v4 = vld [vmem:[#allocation5 + $0x28] sm:$0xff]  ;;  %s453_s11 = scalar_lea.hbm %s1071_s5, %s624_s8  ;;  %s455_s29 = sshll.u32 %s274_s28, 4  ;;  %s456_s29 = int_to_ptr.vmem [resolvable:$true] %s455_s29 }
  0x32   : > { %428 = vmatpush.bf16.msra.mxu1 %v642_v2  ;;  %v640_v5 = vld [vmem:[#allocation7 + $0x28] sm:$0xff]  ;;  %v631_v6 = vld [vmem:[#allocation5 + $0x20] sm:$0xff]  ;;  %v630_v8 = vld [vmem:[#allocation5 + $0x18] sm:$0xff]  ;;  %s457_s30 = sshll.u32 %s453_s11, 4  ;;  %s443_s16 = scalar_lea.sflag [#allocation4], %s1009_s22  ;;  %s458_s30 = int_to_ptr.hbm [resolvable:$true] %s457_s30 }
  0x33   : > { %v639_v7 = vld [vmem:[#allocation7 + $0x20] sm:$0xff]  ;;  %v638_v9 = vld [vmem:[#allocation7 + $0x18] sm:$0xff]  ;;  %v629_v10 = vld [vmem:[#allocation5 + $0x10] sm:$0xff]  ;;  %s818_s25 = sshra.s32 %s458_s30, 4  ;;  %s824_s17 = scalar_lea.hbm %s1071_s5, 24  ;;  %s819_s25 = int_to_ptr.hbm [resolvable:$true] %s818_s25 }
  0x34   : > { %v637_v11 = vld [vmem:[#allocation7 + $0x10] sm:$0xff]  ;;  %v628_v12 = vld [vmem:[#allocation5 + $0x8] sm:$0xff]  ;;  %v627_v13 = vld [vmem:[#allocation5] sm:$0xff]  ;;  %s820_s7 = scalar_lea.hbm %s819_s25, 8  ;;  %p825_p5 = scmp.lt.s32.totalorder %s819_s25, %s1071_s5 }
  0x35   : > { %346 = vmatpush.bf16.msra.mxu0 %v633_v1  ;;  %v275_v14 = vld [vmem:[%s1015_s13] sm:$0xff]  ;;  %v636_v16 = vld [vmem:[#allocation7 + $0x8] sm:$0xff]  ;;  %v635_v17 = vld [vmem:[#allocation7] sm:$0xff]  ;;  %p821_p1 = scmp.ne.s32.totalorder %s819_s25, %s820_s7  ;;  %p826_p6 = scmp.lt.s32.totalorder %s824_s17, %s820_s7 }
  0x36   : > { %429 = vmatpush.bf16.msra.mxu1 %v641_v3  ;;  %v276_v15 = vpack.c.bf16 %v275_v14, %v275_v14  ;;  %v712_v18 = vld [vmem:[%s1068_s2] ss:$0 sm:$0xff] }
  0x37   : > { %v713_v24 = vld [vmem:[%s1070_s4] ss:$0 sm:$0xff]  ;;  %p822_p3 = pnand %p821_p1, %p978_p2  ;;  %p827_p7 = por %p826_p6, %p825_p5 }
  0x39   : > { %347 = vmatpush.bf16.msra.mxu0 %v632_v4  ;;  %p823_p11 = pneg %p822_p3 }
  0x3a   : > { %430 = vmatpush.bf16.msra.mxu1 %v640_v5 }
  0x3b   : > { %p828_p8 = pnand %p827_p7, %p823_p11 }
  0x3d   : > { %348 = vmatpush.bf16.msra.mxu0 %v631_v6 }
  0x3e   : > { %431 = vmatpush.bf16.msra.mxu1 %v639_v7 }
  0x41   : > { %349 = vmatpush.bf16.msra.mxu0 %v630_v8 }
  0x42   : > { %432 = vmatpush.bf16.msra.mxu1 %v638_v9 }
  0x45   : > { %350 = vmatpush.bf16.msra.mxu0 %v629_v10 }
  0x46   : > { %433 = vmatpush.bf16.msra.mxu1 %v637_v11 }
  0x49   : > { %351 = vmatpush.bf16.msra.mxu0 %v628_v12 }
  0x4a   : > { %434 = vmatpush.bf16.msra.mxu1 %v636_v16 }
  0x4d   : > { %352 = vmatpush.bf16.msra.mxu0 %v627_v13 }
  0x4e   : > { %435 = vmatpush.bf16.msra.mxu1 %v635_v17 }
  0x50   : > { %353 = vmatmul.bf16.vlgmr.msra.gmra.mxu0 %v276_v15 }
  0xcd   : > { %v354_v19 = vpop.f32.mrf.mxu0 }
  0xce   : > { %v355_v20 = vadd.f32 %v712_v18, %v354_v19 }
  0xd0   : > { %v358_v21 = vmax.f32 %v355_v20, 0.0 }
  0xd2   : > { %v359_v22 = vpack.c.bf16 %v358_v21, %v358_v21 }
  0xd4   : > { %436 = vmatmul.bf16.vlgmr.msra.gmra.mxu1 %v359_v22 }
  0xd5   : > { %v356_v23 = vpop.f32.mrf.mxu0 }
 0x151   : > { %v437_v25 = vpop.f32.mrf.mxu1 }
 0x152   : > { %v438_v26 = vadd.f32 %v713_v24, %v437_v25 }
 0x154   : > { %441 = vst [vmem:[%s274_s28] sm:$0xff] %v438_v26 }
 0x155   : > { %831 = shalt.err (!%p828_p8)
}
 0x156   : > { %653 = dma.vmem_to_hbm [thread:$0]  (%p978_p2), %s456_s29, 128, %s458_s30, %s443_s16  }
 0x159   : > { %v439_v27 = vpop.f32.mrf.mxu1 }
 0x15a PF: > { %p675_p9 = scmp.ge.s32.totalorder %s874_s21, 2  ;;  %s469_s22 = sand.u32 1, %s862_s18  }
 0x15b   : > { %s470_s9 = scalar_lea.sflag [#allocation4], %s469_s22 }
 0x15c   : > { %p667_p10 = pnand %p675_p9, %p982_p4 }
 0x15e   : > { %p668_p12 = pneg %p667_p10 }
 0x160   : > { %857 = dma.done.wait (%p668_p12), %s470_s9, 128  }
 0x161   : > { %859 = vsyncadd (%p668_p12), %s470_s9, 4294967168  ;;  %p19_p13 = scmp.ge.s32.totalorder %s952_s12, 5   ;;  %s1078_s18 = smov %s866_s19 }
 0x162   : > { %s1079_s19 = smov %s870_s20  ;;  %s1080_s20 = smov %s963_s15 }
 0x163   : > { %s1081_s21 = smov %s952_s12  ;;  %21 = sbr.rel (!%p19_p13) target bundleno = 6 (0x6), region = 93 }
 0x168   :  { %476 = vsyncpa [#allocation3], 1 }
 0x169   :  { %478 = vsyncpa [#allocation3 + $0x1], 1 }
 0x16a   :  { %479 = vsyncpa [#allocation6], 1 }
 0x16b   :  { %480 = vsyncpa [#allocation4], 1 }
 0x16c   :  { %482 = vsyncpa [#allocation4 + $0x1], 1 }

// kernel: tpu_custom_call.1
= control target key start
LH: loop header
LB: loop body
LE: loop exit
PB: predicated region body
PF: predicated region fallthrough
CT: control target
= control target key end

     0   :  { %10 = vsyncpa [#allocation3], 0  ;;  %s1066_s0 = inlined_call_operand.hbm [shape: f32[24,128], index: 0, kind: input, shape index: {}]   ;;  %s1067_s1 = inlined_call_operand.hbm [shape: bf16[128,128], index: 1, kind: input, shape index: {}]   ;;  %s1068_s2 = inlined_call_operand.vmem [shape: f32[1,128], index: 2, kind: input, shape index: {}]   ;;  %s1069_s3 = inlined_call_operand.hbm [shape: bf16[128,128], index: 3, kind: input, shape index: {}]   ;;  %s1070_s4 = inlined_call_operand.vmem [shape: f32[1,128], index: 4, kind: input, shape index: {}]   ;;  %s1071_s5 = inlined_call_operand.hbm [shape: f32[24,128], index: 5, kind: output, shape index: {}]  }
   0x1   :  { %12 = vsyncpa [#allocation3 + $0x1], 0 }
   0x2   :  { %13 = vsyncpa [#allocation6], 0 }
   0x3   :  { %14 = vsyncpa [#allocation4], 0 }
   0x4   :  { %16 = vsyncpa [#allocation4 + $0x1], 0  ;;  %s910_s18 = smov 0   ;;  %s912_s19 = smov 0  }
   0x5   :  { %s914_s20 = smov 0   ;;  %s916_s21 = smov 0  }
   0x6 LB: > { %s174_s24 = sshll.u32 %s1067_s1, 4  ;;  %s934_s25 = sadd.s32 4294967295, %s874_s21   ;;  %s874_s21 = sphi %s916_s21, %s1081_s21   ;;  %s870_s20 = sphi %s914_s20, %s1080_s20   ;;  %s866_s19 = sphi %s912_s19, %s1079_s19   ;;  %s862_s18 = sphi %s910_s18, %s1078_s18   ;;  %s175_s24 = int_to_ptr.hbm [resolvable:$true] %s174_s24 }
   0x7   : > { %p548_p0 = scmp.ge.s32.totalorder %s874_s21, 1  ;;  %p43_p1 = scmp.eq.s32.totalorder %s934_s25, 0 }
   0x8   : > { %p163_p2 = scmp.lt.s32.totalorder %s874_s21, 4  ;;  %s876_s27 = smov [#allocation5]  }
   0x9   : > { %s176_s28 = sshll.u32 %s876_s27, 4  ;;  %s191_s6 = sshll.u32 %s1069_s3, 4  ;;  %s177_s28 = int_to_ptr.vmem [resolvable:$true] %s176_s28  ;;  %s192_s6 = int_to_ptr.hbm [resolvable:$true] %s191_s6 }
   0xa   : > { %p939_p3 = pnand %p548_p0, %p163_p2  ;;  %s877_s7 = smov [#allocation7]  }
   0xb   : > { %s193_s8 = sshll.u32 %s877_s7, 4  ;;  %s878_s9 = smov 64   ;;  %s194_s8 = int_to_ptr.vmem [resolvable:$true] %s193_s8 }
   0xc   : > { %p655_p4 = pneg %p939_p3  ;;  %s879_s10 = smov 4  }
   0xd   : > { %s547_s11 = sadd.s32 4294967294, %s874_s21   ;;  %s952_s12 = sadd.s32 1, %s874_s21  }
   0xe   : > { %p656_p5 = pnand %p655_p4, %p43_p1  ;;  %s26_s13 = ssub.s32 %s874_s21, %s952_s12 }
   0xf   : > { %s29_s14 = sadd.s32 1, %s870_s20  ;;  %p27_p6 = scmp.eq.s32.totalorder %s26_s13, 0 }
  0x10   : > { %658 = dma.hbm_to_vmem [thread:$0]  (!%p656_p5), %s175_s24, 1024, %s177_s28, [#allocation6], %s878_s9, %s878_s9, %s879_s10  }
  0x11   : > { %661 = dma.hbm_to_vmem [thread:$0]  (!%p656_p5), %s192_s6, 1024, %s194_s8, [#allocation6], %s878_s9, %s878_s9, %s879_s10  }
  0x12   : > { %p36_p7 = scmp.ne.s32.totalorder %s870_s20, %s866_s19  ;;  %p37_p8 = scmp.eq.s32.totalorder %s874_s21, 0 }
  0x13   : > { %p42_p9 = scmp.ne.s32.totalorder %s866_s19, %s862_s18  ;;  %p150_p12 = scmp.eq.s32.totalorder %s934_s25, 2 }
  0x14   : > { %s963_s15 = scalar_select %p27_p6, %s870_s20, %s29_s14  }
  0x15   : > { %p965_p10 = por %p37_p8, %p36_p7  ;;  %p971_p11 = por %p43_p1, %p42_p9 }
  0x16   : > { %p156_p13 = scmp.eq.s32.totalorder %s547_s11, 2  ;;  %p672_p0 = scmp.lt.s32.totalorder %s874_s21, 3 }
  0x17   : > { %s210_s22 = sand.u32 1, %s870_s20   ;;  %p978_p2 = por %p150_p12, %p36_p7 }
  0x18   : > { %p982_p4 = por %p156_p13, %p42_p9  ;;  %s552_s27 = sshll.u32 %s210_s22, 3 }
  0x19   : > { %s553_s28 = sshll.u32 %s874_s21, 3  ;;  %s214_s7 = scalar_lea.vmem [#allocation2], %s552_s27 }
  0x1a   : > { %s218_s6 = scalar_lea.hbm %s1066_s0, %s553_s28  ;;  %s222_s8 = sshll.u32 %s214_s7, 4  ;;  %s223_s8 = int_to_ptr.vmem [resolvable:$true] %s222_s8 }
  0x1b   : > { %s220_s9 = sshll.u32 %s218_s6, 4  ;;  %p992_p5 = pnand %p672_p0, %p965_p10  ;;  %s221_s9 = int_to_ptr.hbm [resolvable:$true] %s220_s9 }
  0x1c   : > { %s211_s11 = scalar_lea.sflag [#allocation3], %s210_s22  ;;  %s774_s13 = sshra.s32 %s221_s9, 4  ;;  %s775_s13 = int_to_ptr.hbm [resolvable:$true] %s774_s13 }
  0x1d   : > { %s776_s14 = scalar_lea.hbm %s775_s13, 8  ;;  %p778_p7 = pneg %p992_p5 }
  0x1e   : > { %p777_p6 = scmp.ne.s32.totalorder %s775_s13, %s776_s14  ;;  %s781_s29 = scalar_lea.hbm %s1066_s0, 24 }
  0x1f   : > { %p782_p10 = scmp.lt.s32.totalorder %s775_s13, %s1066_s0  ;;  %p783_p12 = scmp.lt.s32.totalorder %s781_s29, %s776_s14 }
  0x20   : > { %p779_p8 = pnand %p778_p7, %p777_p6 }
  0x21   : > { %p784_p13 = por %p783_p12, %p782_p10 }
  0x22   : > { %p780_p9 = pneg %p779_p8 }
  0x24   : > { %p785_p0 = pnand %p784_p13, %p780_p9 }
  0x26   : > { %788 = shalt.err (!%p785_p0)
}
  0x27   : > { %665 = dma.hbm_to_vmem [thread:$0]  (!%p992_p5), %s221_s9, 128, %s223_s8, %s211_s11  }
  0x28   : > { %231 = sbr.rel (%p939_p3) target bundleno = 346 (0x15a), region = 40  ;;  %s1009_s22 = sand.u32 (!%p939_p3), 1, %s866_s19  }
  0x29   : > { %s555_s6 = sshll.u32 (!%p939_p3), %s1009_s22, 3  ;;  %s234_s7 = scalar_lea.sflag (!%p939_p3), [#allocation3], %s1009_s22 }
  0x2a   : > { %s1015_s13 = scalar_lea.vmem (!%p939_p3), [#allocation2], %s555_s6 }
  0x2d   : > { %849 = dma.done.wait (%p971_p11), %s234_s7, 128  }
  0x2e   : > { %851 = vsyncadd (%p971_p11), %s234_s7, 4294967168 }
  0x2f   : > { %853 = dma.done.wait (%p43_p1), [#allocation6], 2048  }
  0x30   : > { %855 = vsyncadd (%p43_p1), [#allocation6], 4294965248  ;;  %v634_v0 = vld [vmem:[#allocation5 + $0x38] sm:$0xff]  ;;  %v633_v1 = vld [vmem:[#allocation5 + $0x30] sm:$0xff]  ;;  %s624_s8 = sshll.u32 %s934_s25, 3  ;;  %s274_s28 = scalar_lea.vmem [#allocation8], %s555_s6 }
  0x31   : > { %345 = vmatpush.bf16.msra.mxu0 %v634_v0  ;;  %v642_v2 = vld [vmem:[#allocation7 + $0x38] sm:$0xff]  ;;  %v641_v3 = vld [vmem:[#allocation7 + $0x30] sm:$0xff]  ;;  %v632_v4 = vld [vmem:[#allocation5 + $0x28] sm:$0xff]  ;;  %s453_s11 = scalar_lea.hbm %s1071_s5, %s624_s8  ;;  %s455_s29 = sshll.u32 %s274_s28, 4  ;;  %s456_s29 = int_to_ptr.vmem [resolvable:$true] %s455_s29 }
  0x32   : > { %428 = vmatpush.bf16.msra.mxu1 %v642_v2  ;;  %v640_v5 = vld [vmem:[#allocation7 + $0x28] sm:$0xff]  ;;  %v631_v6 = vld [vmem:[#allocation5 + $0x20] sm:$0xff]  ;;  %v630_v8 = vld [vmem:[#allocation5 + $0x18] sm:$0xff]  ;;  %s457_s30 = sshll.u32 %s453_s11, 4  ;;  %s443_s16 = scalar_lea.sflag [#allocation4], %s1009_s22  ;;  %s458_s30 = int_to_ptr.hbm [resolvable:$true] %s457_s30 }
  0x33   : > { %v639_v7 = vld [vmem:[#allocation7 + $0x20] sm:$0xff]  ;;  %v638_v9 = vld [vmem:[#allocation7 + $0x18] sm:$0xff]  ;;  %v629_v10 = vld [vmem:[#allocation5 + $0x10] sm:$0xff]  ;;  %s818_s25 = sshra.s32 %s458_s30, 4  ;;  %s824_s17 = scalar_lea.hbm %s1071_s5, 24  ;;  %s819_s25 = int_to_ptr.hbm [resolvable:$true] %s818_s25 }
  0x34   : > { %v637_v11 = vld [vmem:[#allocation7 + $0x10] sm:$0xff]  ;;  %v628_v12 = vld [vmem:[#allocation5 + $0x8] sm:$0xff]  ;;  %v627_v13 = vld [vmem:[#allocation5] sm:$0xff]  ;;  %s820_s7 = scalar_lea.hbm %s819_s25, 8  ;;  %p825_p5 = scmp.lt.s32.totalorder %s819_s25, %s1071_s5 }
  0x35   : > { %346 = vmatpush.bf16.msra.mxu0 %v633_v1  ;;  %v275_v14 = vld [vmem:[%s1015_s13] sm:$0xff]  ;;  %v636_v16 = vld [vmem:[#allocation7 + $0x8] sm:$0xff]  ;;  %v635_v17 = vld [vmem:[#allocation7] sm:$0xff]  ;;  %p821_p1 = scmp.ne.s32.totalorder %s819_s25, %s820_s7  ;;  %p826_p6 = scmp.lt.s32.totalorder %s824_s17, %s820_s7 }
  0x36   : > { %429 = vmatpush.bf16.msra.mxu1 %v641_v3  ;;  %v276_v15 = vpack.c.bf16 %v275_v14, %v275_v14  ;;  %v712_v18 = vld [vmem:[%s1068_s2] ss:$0 sm:$0xff] }
  0x37   : > { %v713_v24 = vld [vmem:[%s1070_s4] ss:$0 sm:$0xff]  ;;  %p822_p3 = pnand %p821_p1, %p978_p2  ;;  %p827_p7 = por %p826_p6, %p825_p5 }
  0x39   : > { %347 = vmatpush.bf16.msra.mxu0 %v632_v4  ;;  %p823_p11 = pneg %p822_p3 }
  0x3a   : > { %430 = vmatpush.bf16.msra.mxu1 %v640_v5 }
  0x3b   : > { %p828_p8 = pnand %p827_p7, %p823_p11 }
  0x3d   : > { %348 = vmatpush.bf16.msra.mxu0 %v631_v6 }
  0x3e   : > { %431 = vmatpush.bf16.msra.mxu1 %v639_v7 }
  0x41   : > { %349 = vmatpush.bf16.msra.mxu0 %v630_v8 }
  0x42   : > { %432 = vmatpush.bf16.msra.mxu1 %v638_v9 }
  0x45   : > { %350 = vmatpush.bf16.msra.mxu0 %v629_v10 }
  0x46   : > { %433 = vmatpush.bf16.msra.mxu1 %v637_v11 }
  0x49   : > { %351 = vmatpush.bf16.msra.mxu0 %v628_v12 }
  0x4a   : > { %434 = vmatpush.bf16.msra.mxu1 %v636_v16 }
  0x4d   : > { %352 = vmatpush.bf16.msra.mxu0 %v627_v13 }
  0x4e   : > { %435 = vmatpush.bf16.msra.mxu1 %v635_v17 }
  0x50   : > { %353 = vmatmul.bf16.vlgmr.msra.gmra.mxu0 %v276_v15 }
  0xcd   : > { %v354_v19 = vpop.f32.mrf.mxu0 }
  0xce   : > { %v355_v20 = vadd.f32 %v712_v18, %v354_v19 }
  0xd0   : > { %v358_v21 = vmax.f32 %v355_v20, 0.0 }
  0xd2   : > { %v359_v22 = vpack.c.bf16 %v358_v21, %v358_v21 }
  0xd4   : > { %436 = vmatmul.bf16.vlgmr.msra.gmra.mxu1 %v359_v22 }
  0xd5   : > { %v356_v23 = vpop.f32.mrf.mxu0 }
 0x151   : > { %v437_v25 = vpop.f32.mrf.mxu1 }
 0x152   : > { %v438_v26 = vadd.f32 %v713_v24, %v437_v25 }
 0x154   : > { %441 = vst [vmem:[%s274_s28] sm:$0xff] %v438_v26 }
 0x155   : > { %831 = shalt.err (!%p828_p8)
}
 0x156   : > { %653 = dma.vmem_to_hbm [thread:$0]  (%p978_p2), %s456_s29, 128, %s458_s30, %s443_s16  }
 0x159   : > { %v439_v27 = vpop.f32.mrf.mxu1 }
 0x15a PF: > { %p675_p9 = scmp.ge.s32.totalorder %s874_s21, 2  ;;  %s469_s22 = sand.u32 1, %s862_s18  }
 0x15b   : > { %s470_s9 = scalar_lea.sflag [#allocation4], %s469_s22 }
 0x15c   : > { %p667_p10 = pnand %p675_p9, %p982_p4 }
 0x15e   : > { %p668_p12 = pneg %p667_p10 }
 0x160   : > { %857 = dma.done.wait (%p668_p12), %s470_s9, 128  }
 0x161   : > { %859 = vsyncadd (%p668_p12), %s470_s9, 4294967168  ;;  %p19_p13 = scmp.ge.s32.totalorder %s952_s12, 5   ;;  %s1078_s18 = smov %s866_s19 }
 0x162   : > { %s1079_s19 = smov %s870_s20  ;;  %s1080_s20 = smov %s963_s15 }
 0x163   : > { %s1081_s21 = smov %s952_s12  ;;  %21 = sbr.rel (!%p19_p13) target bundleno = 6 (0x6), region = 93 }
 0x168   :  { %476 = vsyncpa [#allocation3], 1 }
 0x169   :  { %478 = vsyncpa [#allocation3 + $0x1], 1 }
 0x16a   :  { %479 = vsyncpa [#allocation6], 1 }
 0x16b   :  { %480 = vsyncpa [#allocation4], 1 }
 0x16c   :  { %482 = vsyncpa [#allocation4 + $0x1], 1 }

</bundles_post_ra>
